<compile_context>
chip_gen: v7x
topology: tpu7x:2x2x1
jax: 0.10.0
libtpu: 0.0.40
codegen_flags: <defaults>
</compile_context>

<pallas_src>
import functools

import jax
import jax.numpy as jnp
from jax.experimental import pallas as pl
from jax.experimental.pallas import tpu as pltpu

STYLE_DIM = 2
EPS = 1e-5                      # PyTorch InstanceNorm2d default eps


# ------------------------- generation-aware sizing --------------------------

def _device_kind():
    try:
        return jax.devices()[0].device_kind.lower()
    except Exception:
        return ""


_KIND = _device_kind()
# v5e / v6e: 128 MiB VMEM, 1 TensorCore.  v7x (or unknown): 64 MiB VMEM, 2 TCs.
_BIG_VMEM = ("v5" in _KIND) or ("v6" in _KIND)
_MULTI_TC = not _BIG_VMEM
_VMEM_LIMIT = (64 << 20) if _BIG_VMEM else (40 << 20)
_TM_CAP = 1024 if _BIG_VMEM else 512
_A_BLOCK_BYTES = 2 << 20        # target bf16 A-tile footprint per buffer

_MM_CP = pltpu.CompilerParams(
    dimension_semantics=("parallel", "parallel"),
    vmem_limit_bytes=_VMEM_LIMIT)
_IN_CP2 = pltpu.CompilerParams(
    dimension_semantics=("parallel", "parallel"),
    vmem_limit_bytes=_VMEM_LIMIT)
_IN_CP3_RED = pltpu.CompilerParams(
    dimension_semantics=("parallel", "parallel", "arbitrary"),
    vmem_limit_bytes=_VMEM_LIMIT)
_IN_CP3_PAR = pltpu.CompilerParams(
    dimension_semantics=("parallel", "parallel", "parallel"),
    vmem_limit_bytes=_VMEM_LIMIT)

_IN_SINGLE_PASS_MAX_HW = 4096   # above this, instance-norm goes two-pass HW-tiled
_IN_TILE_HW = 2048              # HW tile target for the two-pass path


def _largest_divisor(n, cap, align):
    """Largest multiple of `align` that divides `n` and is <= cap (0 if none)."""
    t = min(cap, n)
    t -= t % align
    while t >= align:
        if n % t == 0:
            return t
        t -= align
    return 0


# --------------------------- tiled MXU matmul --------------------------------

def _matmul_kernel(a_ref, b_ref, o_ref, *, activation):
    acc = jnp.dot(a_ref[...], b_ref[...], preferred_element_type=jnp.float32)
    if activation == "tanh":
        acc = jnp.tanh(acc)            # f32 epilogue on the EUP
    o_ref[...] = acc.astype(o_ref.dtype)


def _pick_tm(m, k):
    cap = max(32, min(_TM_CAP, _A_BLOCK_BYTES // max(1, 2 * k)))
    if m % 8 != 0:
        return m                        # full-M block (allowed: equals full dim)
    return (_largest_divisor(m, cap, 16)
            or _largest_divisor(m, cap, 8)
            or m)


def _pick_tn(n):
    if n % 256 == 0:
        return 256
    if n % 128 == 0:
        return 128
    return n                            # lane dim == full N (allowed)


def pallas_matmul(a, b, activation=None, out_dtype=jnp.bfloat16):
    """out = act(a @ b).  bf16 operands, f32 MXU accumulation.

    The whole K dimension lives in one block (K <= ~6K for this model), so
    there is no K grid axis, no accumulator scratch and no K padding.  tm / tn
    are chosen as divisors of M / N, so no output-slice or input-pad HBM round
    trips are needed either."""
    m, k = a.shape
    k2, n = b.shape
    assert k == k2, (a.shape, b.shape)
    a = a.astype(jnp.bfloat16)
    b = b.astype(jnp.bfloat16)

    tn = _pick_tn(n)
    nn = n // tn
    tm = _pick_tm(m, k)
    if _MULTI_TC:
        # make sure at least 2 parallel blocks exist so both TensorCores work
        while (m // tm) * nn < 2 and tm % 16 == 0 and tm >= 32:
            tm //= 2
    nm = m // tm

    # TODO(synk): on v6e there is VMEM headroom for pipeline_mode=pl.Buffered(3)
    # on the A tile; left at default depth-2 buffering for portability.
    return pl.pallas_call(
        functools.partial(_matmul_kernel, activation=activation),
        grid=(nm, nn),
        in_specs=[
            pl.BlockSpec((tm, k), lambda i, j: (i, 0)),
            pl.BlockSpec((k, tn), lambda i, j: (0, j)),
        ],
        out_specs=pl.BlockSpec((tm, tn), lambda i, j: (i, j)),
        out_shape=jax.ShapeDtypeStruct((m, n), out_dtype),
        compiler_params=_MM_CP,
    )(a, b)


# ------------------------------ instance norm --------------------------------

def _in_single_kernel(x_ref, o_ref, *, relu):
    x = x_ref[...].astype(jnp.float32)                 # [1, HW, tc]
    inv_hw = 1.0 / x.shape[1]
    s = jnp.sum(x, axis=1, keepdims=True)
    ss = jnp.sum(x * x, axis=1, keepdims=True)         # single pass: E[x^2]-m^2
    mean = s * inv_hw
    var = jnp.maximum(ss * inv_hw - mean * mean, 0.0)
    y = (x - mean) * jax.lax.rsqrt(var + EPS)
    if relu:
        y = jnp.maximum(y, 0.0)
    o_ref[...] = y.astype(o_ref.dtype)


def _in_single_res_kernel(x_ref, r_ref, o_ref):
    x = x_ref[...].astype(jnp.float32)
    inv_hw = 1.0 / x.shape[1]
    s = jnp.sum(x, axis=1, keepdims=True)
    ss = jnp.sum(x * x, axis=1, keepdims=True)
    mean = s * inv_hw
    var = jnp.maximum(ss * inv_hw - mean * mean, 0.0)
    y = (x - mean) * jax.lax.rsqrt(var + EPS)
    o_ref[...] = (y + r_ref[...].astype(jnp.float32)).astype(o_ref.dtype)


def _in_stats_kernel(x_ref, mu_ref, rs_ref, *, inv_hw):
    """Pass 1 of the HW-tiled path: accumulate sum / sum-of-squares into the
    resident (1, 1, tc) output blocks; finalize to mean / inv-std."""
    h = pl.program_id(2)

    @pl.when(h == 0)
    def _():
        mu_ref[...] = jnp.zeros_like(mu_ref)
        rs_ref[...] = jnp.zeros_like(rs_ref)

    x = x_ref[...].astype(jnp.float32)
    mu_ref[...] += jnp.sum(x, axis=1, keepdims=True)
    rs_ref[...] += jnp.sum(x * x, axis=1, keepdims=True)

    @pl.when(h == pl.num_programs(2) - 1)
    def _():
        mean = mu_ref[...] * inv_hw
        var = jnp.maximum(rs_ref[...] * inv_hw - mean * mean, 0.0)
        mu_ref[...] = mean
        rs_ref[...] = jax.lax.rsqrt(var + EPS)


def _in_apply_kernel(x_ref, mu_ref, rs_ref, o_ref, *, relu):
    y = (x_ref[...].astype(jnp.float32) - mu_ref[...]) * rs_ref[...]
    if relu:
        y = jnp.maximum(y, 0.0)
    o_ref[...] = y.astype(o_ref.dtype)


def _in_apply_res_kernel(x_ref, mu_ref, rs_ref, r_ref, o_ref):
    y = (x_ref[...].astype(jnp.float32) - mu_ref[...]) * rs_ref[...]
    o_ref[...] = (y + r_ref[...].astype(jnp.float32)).astype(o_ref.dtype)


def instance_norm(x_nhwc, relu=False, residual=None, out_dtype=jnp.bfloat16):
    """InstanceNorm2d(affine=False) with optional fused ReLU or residual add.

    Small H*W: one (1, HW, tc) block per (n, channel-block).  Large H*W: a
    two-pass HW-tiled pipeline (stats accumulation, then normalize) so the
    per-step block stays a few MiB regardless of resolution (v7x VMEM safe)."""
    N, H, W, C = x_nhwc.shape
    HW = H * W
    tc = min(128, C)
    assert C % tc == 0
    x3 = x_nhwc.reshape(N, HW, C)
    r3 = residual.reshape(N, HW, C) if residual is not None else None
    out_shape = jax.ShapeDtypeStruct((N, HW, C), out_dtype)

    if HW <= _IN_SINGLE_PASS_MAX_HW:
        spec = pl.BlockSpec((1, HW, tc), lambda n, c: (n, 0, c))
        if residual is None:
            y = pl.pallas_call(
                functools.partial(_in_single_kernel, relu=relu),
                grid=(N, C // tc), in_specs=[spec], out_specs=spec,
                out_shape=out_shape, compiler_params=_IN_CP2,
            )(x3)
        else:
            y = pl.pallas_call(
                _in_single_res_kernel,
                grid=(N, C // tc), in_specs=[spec, spec], out_specs=spec,
                out_shape=out_shape, compiler_params=_IN_CP2,
            )(x3, r3)
        return y.reshape(N, H, W, C)

    # --- two-pass HW-tiled path (production resolutions / v7x VMEM budget) ---
    thw = _largest_divisor(HW, _IN_TILE_HW, 8) or HW
    nhw = HW // thw
    x_spec = pl.BlockSpec((1, thw, tc), lambda n, c, h: (n, h, c))
    s_spec = pl.BlockSpec((1, 1, tc), lambda n, c, h: (n, 0, c))
    stats_shape = jax.ShapeDtypeStruct((N, 1, C), jnp.float32)

    mu, rs = pl.pallas_call(
        functools.partial(_in_stats_kernel, inv_hw=1.0 / HW),
        grid=(N, C // tc, nhw),
        in_specs=[x_spec], out_specs=(s_spec, s_spec),
        out_shape=(stats_shape, stats_shape), compiler_params=_IN_CP3_RED,
    )(x3)

    if residual is None:
        y = pl.pallas_call(
            functools.partial(_in_apply_kernel, relu=relu),
            grid=(N, C // tc, nhw),
            in_specs=[x_spec, s_spec, s_spec], out_specs=x_spec,
            out_shape=out_shape, compiler_params=_IN_CP3_PAR,
        )(x3, mu, rs)
    else:
        y = pl.pallas_call(
            _in_apply_res_kernel,
            grid=(N, C // tc, nhw),
            in_specs=[x_spec, s_spec, s_spec, x_spec], out_specs=x_spec,
            out_shape=out_shape, compiler_params=_IN_CP3_PAR,
        )(x3, mu, rs, r3)
    return y.reshape(N, H, W, C)


# --------------------------- conv glue (im2col) -------------------------------

def _im2col(x_nhwc, kh, kw, stride, pad):
    """Extract conv patches (bf16).  K-index order is (kh, kw, c)."""
    # TODO(synk): patches are still materialized in HBM (kh*kw read
    # amplification); move patch extraction in-kernel (halo-row manual DMA /
    # shifted-window index maps) to reach the HBM roofline at production sizes.
    N, H, W, C = x_nhwc.shape
    xp = jnp.pad(x_nhwc, ((0, 0), (pad, pad), (pad, pad), (0, 0)))
    Hp, Wp = H + 2 * pad, W + 2 * pad
    Ho = (Hp - kh) // stride + 1
    Wo = (Wp - kw) // stride + 1
    cols = []
    for i in range(kh):
        for j in range(kw):
            cols.append(xp[:, i:i + stride * Ho:stride, j:j + stride * Wo:stride, :])
    patches = jnp.concatenate(cols, axis=-1)          # [N, Ho, Wo, kh*kw*C]
    return patches, Ho, Wo


def conv2d(x_nhwc, w_packed, ksize, stride, padding, activation=None,
           out_dtype=jnp.bfloat16):
    """PyTorch-semantics Conv2d (bias=False) with a pre-packed weight matrix
    of shape (ksize*ksize*Cin, Cout)."""
    N, _, _, Cin = x_nhwc.shape
    K, Cout = w_packed.shape
    assert K == ksize * ksize * Cin, (K, ksize, Cin)
    patches, Ho, Wo = _im2col(x_nhwc.astype(jnp.bfloat16), ksize, ksize,
                              stride, padding)
    a = patches.reshape(N * Ho * Wo, K)
    y = pallas_matmul(a, w_packed, activation=activation, out_dtype=out_dtype)
    return y.reshape(N, Ho, Wo, Cout)


def conv_transpose2d(x_nhwc, w_packed, out_dtype=jnp.bfloat16):
    """PyTorch ConvTranspose2d (k=3, s=2, p=1, op=1, bias=False) via the
    sub-pixel decomposition, merged into ONE block-structured matmul:
    A = [x[p,q] | x[p,q+1] | x[p+1,q] | x[p+1,q+1]]  (M x 4Cin),
    B = (4Cin x 4Cout) sub-kernel matrix (zero blocks where a tap does not
    contribute); output columns are the 4 output sub-pixel phases."""
    N, H, W, Cin = x_nhwc.shape
    K4, Cout4 = w_packed.shape
    assert K4 == 4 * Cin
    Cout = Cout4 // 4

    xb = x_nhwc.astype(jnp.bfloat16)
    xp = jnp.pad(xb, ((0, 0), (0, 1), (0, 1), (0, 0)))     # zero bottom/right
    x00 = xb
    x01 = xp[:, :H, 1:W + 1, :]
    x10 = xp[:, 1:H + 1, :W, :]
    x11 = xp[:, 1:H + 1, 1:W + 1, :]
    a = jnp.concatenate([x00, x01, x10, x11], axis=-1).reshape(N * H * W, 4 * Cin)

    y = pallas_matmul(a, w_packed, out_dtype=out_dtype)    # [M, 4*Cout]
    y = y.reshape(N, H, W, 2, 2, Cout)                     # (n, p, q, r, s, c)
    y = jnp.transpose(y, (0, 1, 3, 2, 4, 5))               # (n, p, r, q, s, c)
    return y.reshape(N, 2 * H, 2 * W, Cout)


# ------------------------------- parameters ----------------------------------

def init_params(key, style_dim=STYLE_DIM):
    keys = iter(jax.random.split(key, 32))

    def conv_w(cout, cin, k):
        fan_in = cin * k * k
        return jax.random.normal(next(keys), (cout, cin, k, k), jnp.float32) / jnp.sqrt(fan_in)

    def convT_w(cin, cout, k):
        fan_in = cin * k * k
        return jax.random.normal(next(keys), (cin, cout, k, k), jnp.float32) / jnp.sqrt(fan_in)

    return {
        "input_conv": conv_w(64, 3 + style_dim, 7),
        "enc0": conv_w(128, 64, 3),
        "enc1": conv_w(256, 128, 3),
        "blocks": [(conv_w(256, 256, 3), conv_w(256, 256, 3)) for _ in range(6)],
        "dec0": convT_w(256, 128, 3),
        "dec1": convT_w(128, 64, 3),
        "output_conv": conv_w(3, 64, 7),
    }


def pack_conv_weight(w_oihw):
    """OIHW -> (kh*kw*Cin, Cout) bf16 — matches _im2col's (kh, kw, c) K order."""
    cout = w_oihw.shape[0]
    return jnp.transpose(w_oihw, (2, 3, 1, 0)).reshape(-1, cout).astype(jnp.bfloat16)


def pack_deconv_weight(w_iohw):
    """IOHW (k=3, s=2, p=1, op=1) -> merged sub-pixel matrix (4Cin, 4Cout) bf16.

    Row blocks: [x(p,q), x(p,q+1), x(p+1,q), x(p+1,q+1)];
    column blocks: output phases (2p,2q), (2p,2q+1), (2p+1,2q), (2p+1,2q+1)."""
    cin, cout = w_iohw.shape[0], w_iohw.shape[1]
    z = jnp.zeros((cin, cout), w_iohw.dtype)
    t = lambda i, j: w_iohw[:, :, i, j]
    rows = [
        jnp.concatenate([t(1, 1), t(1, 2), t(2, 1), t(2, 2)], axis=1),
        jnp.concatenate([z,       t(1, 0), z,       t(2, 0)], axis=1),
        jnp.concatenate([z,       z,       t(0, 1), t(0, 2)], axis=1),
        jnp.concatenate([z,       z,       z,       t(0, 0)], axis=1),
    ]
    return jnp.concatenate(rows, axis=0).astype(jnp.bfloat16)


def pack_params(params):
    """One-time packing of all weights into bf16 matmul layout (done at load)."""
    return {
        "input_conv": pack_conv_weight(params["input_conv"]),
        "enc0": pack_conv_weight(params["enc0"]),
        "enc1": pack_conv_weight(params["enc1"]),
        "blocks": [(pack_conv_weight(w1), pack_conv_weight(w2))
                   for (w1, w2) in params["blocks"]],
        "dec0": pack_deconv_weight(params["dec0"]),
        "dec1": pack_deconv_weight(params["dec1"]),
        "output_conv": pack_conv_weight(params["output_conv"]),
    }


# ------------------------------- Generator -----------------------------------

def generator_forward(packed, input_nchw, angles):
    """input_nchw: [N, 3, H, W] (NCHW, like PyTorch); angles: [N, style_dim]."""
    N, _, H, W = input_nchw.shape
    x = jnp.transpose(input_nchw, (0, 2, 3, 1)).astype(jnp.bfloat16)     # NHWC
    ang = jnp.broadcast_to(angles.astype(jnp.bfloat16)[:, None, None, :],
                           (N, H, W, STYLE_DIM))
    x = jnp.concatenate([x, ang], axis=-1)                               # [N,H,W,3+style]

    x = conv2d(x, packed["input_conv"], 7, stride=1, padding=3)
    x = instance_norm(x, relu=True)
    # TODO(synk): training-mode (stochastic) dropout not implemented; F.dropout
    # is the identity at inference.

    x = conv2d(x, packed["enc0"], 3, stride=2, padding=1)
    x = instance_norm(x, relu=True)
    x = conv2d(x, packed["enc1"], 3, stride=2, padding=1)
    x = instance_norm(x, relu=True)

    for (w1, w2) in packed["blocks"]:
        residual = x
        h = conv2d(x, w1, 3, stride=1, padding=1)
        h = instance_norm(h, relu=True)
        h = conv2d(h, w2, 3, stride=1, padding=1)
        x = instance_norm(h, residual=residual)          # fused x = IN(h) + res

    x = conv_transpose2d(x, packed["dec0"])
    x = instance_norm(x, relu=True)
    x = conv_transpose2d(x, packed["dec1"])
    x = instance_norm(x, relu=True)

    x = conv2d(x, packed["output_conv"], 7, stride=1, padding=3,
               activation="tanh", out_dtype=jnp.float32)
    return jnp.transpose(x, (0, 3, 1, 2))                # back to NCHW, f32


if __name__ == "__main__":
    key = jax.random.PRNGKey(0)
    kp, kx, ka, k1, k2, k3, k4, k5 = jax.random.split(key, 8)

    # ---- parity check: conv2d (7x7, stride 1) vs lax reference ----
    xc = jax.random.normal(k1, (1, 9, 10, 5), jnp.float32)
    wc = jax.random.normal(k2, (8, 5, 7, 7), jnp.float32) / jnp.sqrt(5.0 * 49.0)
    got = conv2d(xc, pack_conv_weight(wc), 7, stride=1, padding=3,
                 out_dtype=jnp.float32)
    ref = jax.lax.conv_general_dilated(
        xc, jnp.transpose(wc, (2, 3, 1, 0)), (1, 1), ((3, 3), (3, 3)),
        dimension_numbers=("NHWC", "HWIO", "NHWC"))
    assert float(jnp.max(jnp.abs(got - ref))) < 0.08, "conv2d parity failed"

    # ---- parity check: sub-pixel ConvTranspose2d vs lax reference ----
    xt = jax.random.normal(k3, (1, 5, 6, 8), jnp.float32)
    wt = jax.random.normal(k4, (8, 8, 3, 3), jnp.float32) / jnp.sqrt(8.0 * 9.0)
    got = conv_transpose2d(xt, pack_deconv_weight(wt), out_dtype=jnp.float32)
    w_eq = jnp.flip(jnp.transpose(wt, (2, 3, 0, 1)), axis=(0, 1))
    ref = jax.lax.conv_general_dilated(
        xt, w_eq, (1, 1), ((1, 2), (1, 2)), lhs_dilation=(2, 2),
        dimension_numbers=("NHWC", "HWIO", "NHWC"))
    assert got.shape == ref.shape == (1, 10, 12, 8)
    assert float(jnp.max(jnp.abs(got - ref))) < 0.08, "conv_transpose2d parity failed"

    # ---- parity check: HW-tiled (two-pass) instance norm ----
    xn = jax.random.normal(k5, (1, 96, 96, 128), jnp.float32)
    got = instance_norm(xn, relu=False, out_dtype=jnp.float32)
    mu_r = jnp.mean(xn, axis=(1, 2), keepdims=True)
    var_r = jnp.mean((xn - mu_r) ** 2, axis=(1, 2), keepdims=True)
    ref = (xn - mu_r) * jax.lax.rsqrt(var_r + EPS)
    assert float(jnp.max(jnp.abs(got - ref))) < 5e-2, "instance_norm parity failed"

    # ---- full Generator forward ----
    params = init_params(kp)
    packed = pack_params(params)          # one-time weight packing (bf16)

    x = jax.random.normal(kx, (2, 3, 16, 16), jnp.float32)       # NCHW input
    angles = jax.random.normal(ka, (2, STYLE_DIM), jnp.float32)

    out = jax.jit(generator_forward)(packed, x, angles)
    out = jax.block_until_ready(out)

    assert out.shape == (2, 3, 16, 16), out.shape
    assert out.dtype == jnp.float32
    assert bool(jnp.all(jnp.isfinite(out)))
    assert bool(jnp.all(jnp.abs(out) <= 1.0))                    # tanh output range
    print("KERNEL_OK")
</pallas_src>

<mosaic_0001>
module attributes {stable_mosaic.version = 11 : i64} {
  func.func @_matmul_kernel(%arg0: i32, %arg1: i32, %arg2: memref<90x245xbf16, #tpu.memory_space<vmem>>, %arg3: memref<245x8xbf16, #tpu.memory_space<vmem>>, %arg4: memref<90x8xf32, #tpu.memory_space<vmem>>) attributes {dimension_semantics = [#tpu.dimension_semantics<parallel>, #tpu.dimension_semantics<parallel>], iteration_bounds = array<i64: 1, 1>, scalar_prefetch = 0 : i64, scratch_operands = 0 : i64, tpu.core_type = #tpu.core_type<tc>, window_params = [{transform_indices = @transform_0, window_bounds = array<i64: 90, 245>}, {transform_indices = @transform_1, window_bounds = array<i64: 245, 8>}, {transform_indices = @transform_2, window_bounds = array<i64: 90, 8>}]} {
    %c0 = arith.constant 0 : index
    %c0_0 = arith.constant 0 : index
    %0 = vector.load %arg2[%c0, %c0_0] : memref<90x245xbf16, #tpu.memory_space<vmem>>, vector<90x245xbf16>
    %c0_1 = arith.constant 0 : index
    %c0_2 = arith.constant 0 : index
    %1 = vector.load %arg3[%c0_1, %c0_2] : memref<245x8xbf16, #tpu.memory_space<vmem>>, vector<245x8xbf16>
    %cst = arith.constant dense<0.000000e+00> : vector<90x8xf32>
    %2 = tpu.matmul %0, %1, %cst {dimension_numbers = #tpu.dot_dimension_numbers<[1], [0], [0], [1], [0, 0, 1, 1], [], []>} : vector<90x245xbf16>, vector<245x8xbf16>, vector<90x8xf32> -> vector<90x8xf32>
    %c0_3 = arith.constant 0 : index
    %c0_4 = arith.constant 0 : index
    %3 = vector.load %arg4[%c0_3, %c0_4] : memref<90x8xf32, #tpu.memory_space<vmem>>, vector<90x8xf32>
    tpu.vector_store %arg4[%c0_3, %c0_4], %2 {strides = array<i32>} : memref<90x8xf32, #tpu.memory_space<vmem>>, vector<90x8xf32>,
    return
  }
  func.func @transform_0(%arg0: i32, %arg1: i32) -> (i32, i32) {
    %c0_i32 = arith.constant 0 : i32
    %c0_i32_0 = arith.constant 0 : i32
    return %arg0, %c0_i32 : i32, i32
  }
  func.func @transform_1(%arg0: i32, %arg1: i32) -> (i32, i32) {
    %c0_i32 = arith.constant 0 : i32
    %c0_i32_0 = arith.constant 0 : i32
    return %c0_i32, %arg1 : i32, i32
  }
  func.func @transform_2(%arg0: i32, %arg1: i32) -> (i32, i32) {
    %c0_i32 = arith.constant 0 : i32
    return %arg0, %arg1 : i32, i32
  }
}

</mosaic_0001>

<bundles_post_ra>
// kernel: tpu_custom_call.1
= control target key start
LH: loop header
LB: loop body
LE: loop exit
PB: predicated region body
PF: predicated region fallthrough
CT: control target
= control target key end

     0   :  { %vm221_vm0 = vcmask 1041408   ;;  %vm202_vm1 = vcmask 957440   ;;  %vm222_vm2 = vcmask 1042432   ;;  %v464_v12 = vmov 65535   ;;  %s617_s1 = inlined_call_operand.vmem [shape: bf16[245,8], index: 1, kind: input, shape index: {}]   ;;  %s618_s0 = inlined_call_operand.vmem [shape: bf16[90,245], index: 0, kind: input, shape index: {}]   ;;  %s619_s2 = inlined_call_operand.vmem [shape: f32[90,8], index: 2, kind: output, shape index: {}]  }
   0x1   :  { %v430_v0 = vld [vmem:[%s617_s1 + $0x40] sm:$0xff]   ;;  %v432_v2 = vld [vmem:[%s617_s1 + $0x48] sm:$0xff]   ;;  %v434_v4 = vld [vmem:[%s617_s1 + $0x50] sm:$0xff]   ;;  %v223_v13 = vsel %vm221_vm0, 4294967295, %v464_v12  ;;  %vm309_vm3 = vcmask 64512   ;;  %vm321_vm4 = vcmask 58368  }
   0x2   :  { %v431_v1 = vld [vmem:[%s617_s1] sm:$0xff]   ;;  %361 = vmatprep.subr.bf16.mxu0 %v430_v0  ;;  %413 = vmatprep.subr.bf16.mxu1 %v430_v0  ;;  %v433_v3 = vld [vmem:[%s617_s1 + $0x8] sm:$0xff]   ;;  %v435_v5 = vld [vmem:[%s617_s1 + $0x10] sm:$0xff]   ;;  %v224_v18 = vsel %vm222_vm2, %v223_v13, 0 }
   0x3   :  { %362 = vmatpush3.bf16.msra.mxu0 %v431_v1  ;;  %421 = vmatpush3.bf16.msra.mxu1 %v431_v1  ;;  %v436_v6 = vld [vmem:[%s617_s1 + $0x58] sm:$0xff]   ;;  %v438_v8 = vld [vmem:[%s617_s1 + $0x60] sm:$0xff]   ;;  %v440_v10 = vld [vmem:[%s617_s1 + $0x68] sm:$0xff]  }
   0x4   :  { %363 = vmatprep.subr.bf16.mxu0 %v432_v2  ;;  %414 = vmatprep.subr.bf16.mxu1 %v432_v2  ;;  %v437_v7 = vld [vmem:[%s617_s1 + $0x18] sm:$0xff]   ;;  %v439_v9 = vld [vmem:[%s617_s1 + $0x20] sm:$0xff]   ;;  %v441_v15 = vld [vmem:[%s617_s1 + $0x28] sm:$0xff]  }
   0x5   :  { %v448_v11 = vld [vmem:[%s618_s0 + $0x4] ss:$8 sps:$4 sm:$0xff]   ;;  %v451_v14 = vld [vmem:[%s618_s0 + $0x34] ss:$8 sps:$4 sm:$0xff]   ;;  %v446_v22 = vld [vmem:[%s618_s0] ss:$8 sps:$4 sm:$0xff]  }
   0x6   :  { %355 = vmatprep.mubr.msk.bf16.mxu0 %vm202_vm1, %v448_v11  ;;  %v442_v16 = vld [vmem:[%s617_s1 + $0x70] sm:$0xff]   ;;  %v444_v17 = vld [vmem:[%s617_s1 + $0x78] ss:$0 sps:$4 sm:$0x77]   ;;  %358 = vmatprep.mubr.msk.bf16.mxu1 %vm202_vm1, %v451_v14  ;;  %v454_v25 = vld [vmem:[%s618_s0 + $0x44] ss:$8 sps:$4 sm:$0xff]  }
   0x7   :  { %364 = vmatpush3.bf16.msra.mxu0 %v433_v3  ;;  %422 = vmatpush3.bf16.msra.mxu1 %v433_v3  ;;  %v443_v19 = vld [vmem:[%s617_s1 + $0x30] sm:$0xff]   ;;  %v226_v20 = vand.u32 %v444_v17, %v224_v18  ;;  %v445_v21 = vld [vmem:[%s617_s1 + $0x38] sm:$0xff]   ;;  %v457_v27 = vld [vmem:[%s618_s0 + $0x40] ss:$8 sps:$4 sm:$0xff]  }
   0x8   :  { %365 = vmatprep.subr.bf16.mxu0 %v434_v4  ;;  %415 = vmatprep.subr.bf16.mxu1 %v434_v4  ;;  %v449_v23 = vld [vmem:[%s618_s0 + $0x30] ss:$8 sps:$4 sm:$0xff]   ;;  %v452_v24 = vld [vmem:[%s618_s0 + $0x14] ss:$8 sps:$4 sm:$0xff]   ;;  %v458_v28 = vld [vmem:[%s618_s0 + $0x24] ss:$8 sps:$4 sm:$0xff]  }
   0x9   :  { %v456_v26 = vld [vmem:[%s618_s0 + $0x10] ss:$8 sps:$4 sm:$0xff]   ;;  %v460_v29 = vld [vmem:[%s618_s0 + $0x54] ss:$8 sps:$4 sm:$0x1f]  }
   0xa   :  { %v462_v30 = vld [vmem:[%s618_s0 + $0x20] ss:$8 sps:$4 sm:$0xff]   ;;  %v463_v31 = vld [vmem:[%s618_s0 + $0x50] ss:$8 sps:$4 sm:$0x1f]  }
   0xb   :  { %366 = vmatpush3.bf16.msra.mxu0 %v435_v5  ;;  %423 = vmatpush3.bf16.msra.mxu1 %v435_v5 }
   0xc   :  { %367 = vmatprep.subr.bf16.mxu0 %v436_v6  ;;  %416 = vmatprep.subr.bf16.mxu1 %v436_v6 }
   0xf   :  { %368 = vmatpush3.bf16.msra.mxu0 %v437_v7  ;;  %424 = vmatpush3.bf16.msra.mxu1 %v437_v7 }
  0x10   :  { %369 = vmatprep.subr.bf16.mxu0 %v438_v8  ;;  %417 = vmatprep.subr.bf16.mxu1 %v438_v8 }
  0x13   :  { %370 = vmatpush3.bf16.msra.mxu0 %v439_v9  ;;  %425 = vmatpush3.bf16.msra.mxu1 %v439_v9 }
  0x14   :  { %371 = vmatprep.subr.bf16.mxu0 %v440_v10  ;;  %418 = vmatprep.subr.bf16.mxu1 %v440_v10 }
  0x17   :  { %372 = vmatpush3.bf16.msra.mxu0 %v441_v15  ;;  %426 = vmatpush3.bf16.msra.mxu1 %v441_v15 }
  0x18   :  { %373 = vmatprep.subr.bf16.mxu0 %v442_v16  ;;  %419 = vmatprep.subr.bf16.mxu1 %v442_v16 }
  0x1b   :  { %374 = vmatpush3.bf16.msra.mxu0 %v443_v19  ;;  %427 = vmatpush3.bf16.msra.mxu1 %v443_v19 }
  0x1c   :  { %375 = vmatprep.subr.bf16.mxu0 %v226_v20  ;;  %420 = vmatprep.subr.bf16.mxu1 %v226_v20 }
  0x1f   :  { %376 = vmatpush3.bf16.msra.mxu0 %v445_v21  ;;  %428 = vmatpush3.bf16.msra.mxu1 %v445_v21 }
  0x22   :  { %261 = vmatmul.mubr.bf16.vlgmr.msra.gmra.mrb[0].mxu0 %v446_v22  ;;  %285 = vmatmul.mubr.bf16.vlgmr.msra.gmra.mrb[0].mxu1 %v449_v23 }
  0x23   :  { %356 = vmatprep.mubr.msk.bf16.mxu0 %vm202_vm1, %v452_v24  ;;  %359 = vmatprep.mubr.msk.bf16.mxu1 %vm202_vm1, %v454_v25 }
  0x2a   :  { %269 = vmatmul.mubr.bf16.gmra.mrb[4].mxu0 %v456_v26  ;;  %293 = vmatmul.mubr.bf16.gmra.mrb[4].mxu1 %v457_v27 }
  0x2b   :  { %357 = vmatprep.mubr.msk.bf16.mxu0 %vm202_vm1, %v458_v28  ;;  %360 = vmatprep.mubr.msk.bf16.mxu1 %vm202_vm1, %v460_v29 }
  0x32   :  { %277 = vmatmul.mubr.bf16.gmra.mrb[8].mxu0 %v462_v30  ;;  %301 = vmatmul.mubr.bf16.gmra.mrb[8].mxu1 %v463_v31 }
  0xf5   :  { %v377_v32 = vpop.f32.mrb[0].mxu0  ;;  %v395_v33 = vpop.f32.mrb[0].mxu1 }
  0xf6   :  { %v378_v34 = vpop.f32.mrb[1].mxu0  ;;  %v396_v35 = vpop.f32.mrb[1].mxu1 }
  0xf7   :  { %v379_v36 = vadd.f32 %v378_v34, %v377_v32  ;;  %v397_v37 = vadd.f32 %v396_v35, %v395_v33  ;;  %v380_v38 = vpop.f32.mrb[2].mxu0  ;;  %v398_v39 = vpop.f32.mrb[2].mxu1 }
  0xf8   :  { %v381_v40 = vpop.f32.mrb[3].mxu0  ;;  %v399_v41 = vpop.f32.mrb[3].mxu1 }
  0xf9   :  { %310 = vst.msk [vmem:[%s619_s2] sm:$0xff] %vm309_vm3, %v379_v36  ;;  %316 = vst.msk [vmem:[%s619_s2 + $0x30] sm:$0xff] %vm309_vm3, %v397_v37  ;;  %v382_v42 = vadd.f32 %v381_v40, %v380_v38  ;;  %v400_v43 = vadd.f32 %v399_v41, %v398_v39 }
  0xfb   :  { %311 = vst.msk [vmem:[%s619_s2 + $0x8] sm:$0xff] %vm309_vm3, %v382_v42  ;;  %317 = vst.msk [vmem:[%s619_s2 + $0x38] sm:$0xff] %vm309_vm3, %v400_v43 }
  0xfd   :  { %v383_v44 = vpop.f32.mrb[4].mxu0  ;;  %v401_v45 = vpop.f32.mrb[4].mxu1 }
  0xfe   :  { %v384_v46 = vpop.f32.mrb[5].mxu0  ;;  %v402_v47 = vpop.f32.mrb[5].mxu1 }
  0xff   :  { %v385_v48 = vadd.f32 %v384_v46, %v383_v44  ;;  %v403_v49 = vadd.f32 %v402_v47, %v401_v45  ;;  %v386_v50 = vpop.f32.mrb[6].mxu0  ;;  %v404_v51 = vpop.f32.mrb[6].mxu1 }
 0x100   :  { %v387_v52 = vpop.f32.mrb[7].mxu0  ;;  %v405_v53 = vpop.f32.mrb[7].mxu1 }
 0x101   :  { %312 = vst.msk [vmem:[%s619_s2 + $0x10] sm:$0xff] %vm309_vm3, %v385_v48  ;;  %318 = vst.msk [vmem:[%s619_s2 + $0x40] sm:$0xff] %vm309_vm3, %v403_v49  ;;  %v388_v54 = vadd.f32 %v387_v52, %v386_v50  ;;  %v406_v55 = vadd.f32 %v405_v53, %v404_v51 }
 0x103   :  { %313 = vst.msk [vmem:[%s619_s2 + $0x18] sm:$0xff] %vm309_vm3, %v388_v54  ;;  %319 = vst.msk [vmem:[%s619_s2 + $0x48] sm:$0xff] %vm309_vm3, %v406_v55 }
 0x105   :  { %v389_v56 = vpop.f32.mrb[8].mxu0  ;;  %v407_v57 = vpop.f32.mrb[8].mxu1 }
 0x106   :  { %v390_v58 = vpop.f32.mrb[9].mxu0  ;;  %v408_v59 = vpop.f32.mrb[9].mxu1 }
 0x107   :  { %v391_v60 = vadd.f32 %v390_v58, %v389_v56  ;;  %v409_v61 = vadd.f32 %v408_v59, %v407_v57  ;;  %v392_v62 = vpop.f32.mrb[10].mxu0  ;;  %v410_v63 = vpop.f32.mrb[10].mxu1 }
 0x108   :  { %v393_v0 = vpop.f32.mrb[11].mxu0  ;;  %v411_v1 = vpop.f32.mrb[11].mxu1 }
 0x109   :  { %314 = vst.msk [vmem:[%s619_s2 + $0x20] sm:$0xff] %vm309_vm3, %v391_v60  ;;  %320 = vst.msk [vmem:[%s619_s2 + $0x50] sm:$0xff] %vm309_vm3, %v409_v61  ;;  %v394_v2 = vadd.f32 %v393_v0, %v392_v62  ;;  %v412_v3 = vadd.f32 %v411_v1, %v410_v63 }
 0x10b   :  { %315 = vst.msk [vmem:[%s619_s2 + $0x28] sm:$0xff] %vm309_vm3, %v394_v2 }
 0x10c   :  { %322 = vst.msk [vmem:[%s619_s2 + $0x58] sm:$0x3] %vm321_vm4, %v412_v3 }

</bundles_post_ra>
